<compile_context>
chip_gen: v6e
topology: v6e:2x2x1
jax: 0.10.0
libtpu: 0.0.40
codegen_flags: <defaults>
</compile_context>

<pallas_src>
import functools

import jax
import jax.numpy as jnp
from jax.experimental import pallas as pl
from jax.experimental.pallas import tpu as pltpu


# ---------------------------------------------------------------------------
# Tiling policy
# ---------------------------------------------------------------------------
_LANE_CHOICES = (2048, 1024, 512, 256, 128)   # lane-dense widths (multiples of 128)
_ROW_GRAN = 16                                # row-tile granularity (safe for f32 & bf16)
_VMEM_LIMIT = 48 << 20                        # scoped VMEM: fits v5e/v6e (128 MiB) & v7x (64 MiB)


def _round_up(n: int, m: int) -> int:
    return (n + m - 1) // m * m


@functools.lru_cache(maxsize=None)
def _target_block_bytes() -> int:
    """Per-block HBM byte budget, gated on chip generation.

    v7x (64 MiB VMEM, 3.2 TB/s HBM): 1 MiB blocks are overhead-bound -> 4 MiB.
    v5e/v6e (128 MiB VMEM): ~2 MiB blocks already sit near the HBM roofline.
    """
    try:
        info = pltpu.get_tpu_info()
        vmem = getattr(info, "vmem_capacity_bytes", None)
        if vmem is not None and vmem <= (96 << 20):     # v7x-class (64 MiB/TC)
            return 4 << 20
    except Exception:
        pass
    return 2 << 20


def _compiler_params():
    return pltpu.CompilerParams(
        dimension_semantics=("parallel",),
        vmem_limit_bytes=_VMEM_LIMIT,
    )


def _pick_tile_rows(rows: int, row_bytes: int, target_bytes: int) -> int:
    """Row tile sized to ~target_bytes, keeping >=2 grid steps when possible
    (v7x has 2 TensorCores; a single-step grid also disables pipelining)."""
    g = _ROW_GRAN
    if rows <= g:
        return rows
    tr = max(g, (target_bytes // max(row_bytes, 1)) // g * g)
    tr = min(tr, rows)
    if tr >= rows and rows >= 2 * g:
        half = -(-rows // 2)
        tr = min(rows, max(g, -(-half // g) * g))
    return tr


# ---------------------------------------------------------------------------
# Kernel bodies (all math internals in f32; bf16 only at the HBM boundary)
# ---------------------------------------------------------------------------
def _make_elementwise_kernel(task: str, use_bias: bool):
    """binary (sigmoid) or regression (identity+bias) on a lane-dense tile."""

    def compute(x_ref, o_ref, bias_ref):
        x = x_ref[...].astype(jnp.float32)
        if use_bias:
            x = x + bias_ref[0].astype(jnp.float32)   # single hoisted SMEM scalar read
        if task == "binary":
            out = 1.0 / (1.0 + jnp.exp(-x))           # exact sigmoid (mem-bound: free)
        else:                                         # regression (with bias)
            out = x
        o_ref[...] = out.astype(o_ref.dtype)

    if use_bias:
        return lambda x_ref, b_ref, o_ref: compute(x_ref, o_ref, b_ref)
    return lambda x_ref, o_ref: compute(x_ref, o_ref, None)


def _multiclass_rowwise_kernel(x_ref, o_ref):
    """Softmax over the last axis in natural [B, C] layout (C >= 128, or small
    awkward C fallback).  Bias is dropped: softmax is shift-invariant."""
    x = x_ref[...].astype(jnp.float32)
    m = jnp.max(x, axis=-1, keepdims=True)
    e = jnp.exp(x - m)
    d = jnp.sum(e, axis=-1, keepdims=True)
    o_ref[...] = (e / d).astype(o_ref.dtype)


def _make_multiclass_flat_kernel(C: int):
    """Softmax over aligned groups of C lanes in a lane-dense (rows, 128) view.

    Per-group max/sum are XOR-butterfly all-reduces built from pltpu.roll on
    the 128-lane axis (XLU), so both loads and stores stay full-width.
    Requires C to be a power of two with C | 128.  Bias dropped (shift-inv.).
    """
    steps = []
    s = 1
    while s < C:
        steps.append(s)
        s *= 2

    def kernel(x_ref, o_ref):
        x = x_ref[...].astype(jnp.float32)            # (tile_rows, 128)
        lanes = x.shape[-1]                           # 128
        lane_i = jax.lax.broadcasted_iota(jnp.int32, x.shape, x.ndim - 1)
        lane_f = lane_i.astype(jnp.float32)

        # Which roll direction reaches lane ^ s?  Derived by rolling the lane
        # iota itself -> independent of the roll sign convention.
        masks = []
        for st in steps:
            src = pltpu.roll(lane_f, shift=st, axis=1)
            masks.append(src == (lane_i ^ st).astype(jnp.float32))

        def group_allreduce(v, op):
            for st, m in zip(steps, masks):
                a = pltpu.roll(v, shift=st, axis=1)
                b = pltpu.roll(v, shift=lanes - st, axis=1)
                v = op(v, jnp.where(m, a, b))
            return v

        m_g = group_allreduce(x, jnp.maximum)         # per-group max, broadcast to group
        e = jnp.exp(x - m_g)
        denom = group_allreduce(e, jnp.add)           # per-group sum, broadcast to group
        o_ref[...] = (e / denom).astype(o_ref.dtype)  # exact divide (probabilities)

    return kernel


# ---------------------------------------------------------------------------
# Forward paths
# ---------------------------------------------------------------------------
def _elementwise_forward(x, bias_args, task, out_dtype):
    B, C = x.shape
    N = B * C
    itemsize = jnp.dtype(x.dtype).itemsize
    kernel = _make_elementwise_kernel(task, bool(bias_args))
    target = _target_block_bytes()

    # Lane-dense flattened view (last dim = multiple of 128 -> unmasked vst).
    lane = next((L for L in _LANE_CHOICES if N >= L and N % L == 0), None)
    n_pad = N
    if lane is None:
        # Pad the flat element stream once; one cheap extra pass beats running
        # the whole stream with masked (sub-128-lane) partial stores.
        lane = 512 if N >= 512 else 128
        n_pad = _round_up(N, lane)

    flat = x.reshape(-1)
    if n_pad != N:
        flat = jnp.pad(flat, (0, n_pad - N))
    rows = n_pad // lane
    x2d = flat.reshape(rows, lane)

    tile_rows = _pick_tile_rows(rows, lane * itemsize, target)
    block = (tile_rows, lane)
    idx = lambda i: (i, 0)
    in_specs = [pl.BlockSpec(block, idx)]
    in_specs += [pl.BlockSpec(memory_space=pltpu.MemorySpace.SMEM)] * len(bias_args)

    out2d = pl.pallas_call(
        kernel,
        out_shape=jax.ShapeDtypeStruct((rows, lane), out_dtype),
        grid=(pl.cdiv(rows, tile_rows),),
        in_specs=in_specs,
        out_specs=pl.BlockSpec(block, idx),
        compiler_params=_compiler_params(),
    )(x2d, *bias_args)

    out = out2d.reshape(-1)
    if n_pad != N:
        out = out[:N]
    return out.reshape(B, C)


def _multiclass_forward(x, out_dtype):
    B, C = x.shape
    itemsize = jnp.dtype(x.dtype).itemsize
    # Softmax keeps more live whole-block temporaries -> half the budget.
    target = max(1 << 20, _target_block_bytes() // 2)

    small_pow2 = (C & (C - 1)) == 0 and 1 <= C <= 128

    if C >= 128 or not small_pow2:
        # Natural [B, C] layout: already lane-dense for C >= 128.
        # TODO(synk): small non-power-of-two C (e.g. 10) takes this fallback and
        # stores with masked lanes; still a single HBM pass (no host transposes).
        tile_b = _pick_tile_rows(B, C * itemsize, target)
        block = (tile_b, C)
        idx = lambda i: (i, 0)
        return pl.pallas_call(
            _multiclass_rowwise_kernel,
            out_shape=jax.ShapeDtypeStruct((B, C), out_dtype),
            grid=(pl.cdiv(B, tile_b),),
            in_specs=[pl.BlockSpec(block, idx)],
            out_specs=pl.BlockSpec(block, idx),
            compiler_params=_compiler_params(),
        )(x)

    # Lane-dense flat path for small power-of-two class counts (C | 128).
    groups_per_row = 128 // C
    b_pad = _round_up(B, groups_per_row)
    xp = x if b_pad == B else jnp.pad(x, ((0, b_pad - B), (0, 0)))  # zero rows -> uniform softmax, sliced off
    rows = (b_pad * C) // 128
    x2d = xp.reshape(rows, 128)

    tile_rows = _pick_tile_rows(rows, 128 * itemsize, target)
    block = (tile_rows, 128)
    idx = lambda i: (i, 0)
    out2d = pl.pallas_call(
        _make_multiclass_flat_kernel(C),
        out_shape=jax.ShapeDtypeStruct((rows, 128), out_dtype),
        grid=(pl.cdiv(rows, tile_rows),),
        in_specs=[pl.BlockSpec(block, idx)],
        out_specs=pl.BlockSpec(block, idx),
        compiler_params=_compiler_params(),
    )(x2d)

    out = out2d.reshape(b_pad, C)
    return out if b_pad == B else out[:B]


# ---------------------------------------------------------------------------
# Public wrapper (matches PredictionLayer.forward)
# ---------------------------------------------------------------------------
@functools.partial(jax.jit, static_argnames=("task", "use_bias", "out_dtype"))
def prediction_layer(x, bias=None, *, task: str = "binary", use_bias: bool = True,
                     out_dtype=None):
    """Pallas implementation of PredictionLayer.forward.

    x:         [batch, classes]
    bias:      [1] float (required when use_bias=True)
    out_dtype: optional output dtype (e.g. bf16 to halve the write stream).
    """
    if task not in ("binary", "multiclass", "regression"):
        raise ValueError("task must be binary, multiclass or regression")
    if x.ndim != 2:
        raise ValueError("expected input of shape [batch, classes]")
    out_dtype = x.dtype if out_dtype is None else jnp.dtype(out_dtype)

    # Identity fast path: no bias, no activation -> no kernel launch.
    if task == "regression" and not use_bias:
        return x.astype(out_dtype)

    if use_bias:
        if bias is None:
            raise ValueError("use_bias=True requires a bias parameter")
        bias_args = (bias.reshape((1,)).astype(jnp.float32),)   # SMEM scalar
    else:
        bias_args = ()

    if task == "multiclass":
        # Scalar bias is dropped in-kernel: softmax(x + b) == softmax(x).
        return _multiclass_forward(x, out_dtype)
    return _elementwise_forward(x, bias_args, task, out_dtype)


if __name__ == "__main__":
    key = jax.random.PRNGKey(0)

    # Small shapes consistent with the module: [batch, classes].
    batch, classes = 2, 8
    x = jax.random.normal(key, (batch, classes), dtype=jnp.float32)

    # Parameter init matches nn.Parameter(torch.zeros((1,))).
    bias = jnp.zeros((1,), dtype=jnp.float32)

    # TODO(synk): the torch module raises ValueError on NaN/Inf; no clean
    # in-kernel equivalent, so the finiteness guard stays host-side (demo only).
    assert bool(jnp.isfinite(x).all()), "Input tensor contains NaN or Inf values."

    out_binary = prediction_layer(x, bias, task="binary", use_bias=True)
    out_multi = prediction_layer(x, bias, task="multiclass", use_bias=True)
    out_reg = prediction_layer(x, bias, task="regression", use_bias=True)
    out_reg_nb = prediction_layer(x, None, task="regression", use_bias=False)
    jax.block_until_ready((out_binary, out_multi, out_reg, out_reg_nb))

    assert jnp.allclose(out_binary, jax.nn.sigmoid(x + bias), atol=1e-5, rtol=1e-5)
    assert jnp.allclose(out_multi, jax.nn.softmax(x + bias, axis=-1), atol=1e-5, rtol=1e-5)
    assert jnp.allclose(out_reg, x + bias, atol=1e-6, rtol=1e-6)
    assert jnp.allclose(out_reg_nb, x)

    # Larger shapes: exercise the tiled, multi-step-grid, lane-dense paths.
    xb = jax.random.normal(jax.random.PRNGKey(1), (65536, 8), dtype=jnp.float32)
    ob = prediction_layer(xb, bias, task="binary", use_bias=True)
    om = prediction_layer(xb, bias, task="multiclass", use_bias=True)
    jax.block_until_ready((ob, om))
    assert jnp.allclose(ob, jax.nn.sigmoid(xb + bias), atol=1e-5, rtol=1e-5)
    assert jnp.allclose(om, jax.nn.softmax(xb + bias, axis=-1), atol=1e-5, rtol=1e-5)

    # Wide-class (natural-layout) softmax, padded elementwise, awkward-C fallback.
    xc = jax.random.normal(jax.random.PRNGKey(2), (512, 256), dtype=jnp.float32)
    oc = prediction_layer(xc, bias, task="multiclass", use_bias=True)
    xd = jax.random.normal(jax.random.PRNGKey(3), (7, 9), dtype=jnp.float32)
    od = prediction_layer(xd, bias, task="binary", use_bias=True)
    xe = jax.random.normal(jax.random.PRNGKey(4), (64, 10), dtype=jnp.float32)
    oe = prediction_layer(xe, bias, task="multiclass", use_bias=True)
    jax.block_until_ready((oc, od, oe))
    assert jnp.allclose(oc, jax.nn.softmax(xc, axis=-1), atol=1e-5, rtol=1e-5)
    assert jnp.allclose(od, jax.nn.sigmoid(xd), atol=1e-5, rtol=1e-5)
    assert jnp.allclose(oe, jax.nn.softmax(xe, axis=-1), atol=1e-5, rtol=1e-5)

    # bf16 I/O path (bytes-halving; internals stay f32).
    xh = jax.random.normal(jax.random.PRNGKey(5), (4096, 8), dtype=jnp.bfloat16)
    oh = prediction_layer(xh, bias, task="binary", use_bias=True)
    jax.block_until_ready(oh)
    assert jnp.allclose(oh.astype(jnp.float32),
                        jax.nn.sigmoid(xh.astype(jnp.float32)), atol=1e-2, rtol=1e-2)

    print("KERNEL_OK")
</pallas_src>

<mosaic_0001>
module attributes {stable_mosaic.version = 11 : i64} {
  func.func @_lambda_(%arg0: i32, %arg1: memref<1x128xf32, #tpu.memory_space<vmem>>, %arg2: memref<1xf32, #tpu.memory_space<smem>>, %arg3: memref<1x128xf32, #tpu.memory_space<vmem>>) attributes {dimension_semantics = [#tpu.dimension_semantics<parallel>], iteration_bounds = array<i64: 1>, scalar_prefetch = 0 : i64, scratch_operands = 0 : i64, tpu.core_type = #tpu.core_type<tc>, window_params = [{transform_indices = @transform_0, window_bounds = array<i64: 1, 128>}, {transform_indices = @transform_1, window_bounds = array<i64: 1>}, {transform_indices = @transform_2, window_bounds = array<i64: 1, 128>}]} {
    %c0 = arith.constant 0 : index
    %c0_0 = arith.constant 0 : index
    %0 = vector.load %arg1[%c0, %c0_0] : memref<1x128xf32, #tpu.memory_space<vmem>>, vector<1x128xf32>
    %c0_1 = arith.constant 0 : index
    %1 = memref.load %arg2[%c0_1] : memref<1xf32, #tpu.memory_space<smem>>
    %2 = vector.broadcast %1 : f32 to vector<1x128xf32>
    %3 = arith.addf %0, %2 : vector<1x128xf32>
    %cst = arith.constant 0.000000e+00 : f32
    %4 = vector.broadcast %cst : f32 to vector<1x128xf32>
    %5 = arith.subf %4, %3 : vector<1x128xf32>
    %6 = math.exp %5 : vector<1x128xf32>
    %cst_2 = arith.constant 1.000000e+00 : f32
    %7 = vector.broadcast %cst_2 : f32 to vector<1x128xf32>
    %8 = arith.addf %7, %6 : vector<1x128xf32>
    %cst_3 = arith.constant 1.000000e+00 : f32
    %9 = vector.broadcast %cst_3 : f32 to vector<1x128xf32>
    %10 = arith.divf %9, %8 : vector<1x128xf32>
    %c0_4 = arith.constant 0 : index
    %c0_5 = arith.constant 0 : index
    %11 = vector.load %arg3[%c0_4, %c0_5] : memref<1x128xf32, #tpu.memory_space<vmem>>, vector<1x128xf32>
    tpu.vector_store %arg3[%c0_4, %c0_5], %10 {strides = array<i32>} : memref<1x128xf32, #tpu.memory_space<vmem>>, vector<1x128xf32>,
    return
  }
  func.func @transform_0(%arg0: i32) -> (i32, i32) {
    %c0_i32 = arith.constant 0 : i32
    %c0_i32_0 = arith.constant 0 : i32
    return %arg0, %c0_i32 : i32, i32
  }
  func.func @transform_1(%arg0: i32) -> i32 {
    %c0_i32 = arith.constant 0 : i32
    %c0_i32_0 = arith.constant 0 : i32
    return %c0_i32 : i32
  }
  func.func @transform_2(%arg0: i32) -> (i32, i32) {
    %c0_i32 = arith.constant 0 : i32
    %c0_i32_0 = arith.constant 0 : i32
    return %arg0, %c0_i32 : i32, i32
  }
}

</mosaic_0001>

<bundles_post_ra>
// kernel: prediction_layer.1
= control target key start
LH: loop header
LB: loop body
LE: loop exit
PB: predicated region body
PF: predicated region fallthrough
CT: control target
= control target key end

     0   :  { %s55_s0 = inlined_call_operand.vmem [shape: f32[1,128], index: 0, kind: input, shape index: {}]   ;;  %s56_s1 = inlined_call_operand.<no memory space> [shape: f32[1], index: 1, kind: input, shape index: {}]   ;;  %s57_s2 = inlined_call_operand.vmem [shape: f32[1,128], index: 2, kind: output, shape index: {}]  }
   0x1   :  { %v12_v0 = vld [vmem:[%s55_s0] sm:$0x1]  ;;  %v14_v1 = vstv %s56_s1 }
   0x2   :  { %v15_v2 = vadd.f32 %v14_v1, %v12_v0 }
   0x4   :  { %v16_v3 = vsub.f32 0.0, %v15_v2 }
   0x6   :  { %v17_v4 = vmul.f32 1.442695, %v16_v3 }
   0x8   :  { %27 = vpow2.f32 %v17_v4 }
  0x15   :  { %v28_v5 = vpop.eup %27 }
  0x16   :  { %v19_v6 = vadd.f32 1.0, %v28_v5 }
  0x18   :  { %29 = vrcp.f32 %v19_v6 }
  0x25   :  { %v30_v7 = vpop.eup %29 }
  0x26   :  { %22 = vst [vmem:[%s57_s2] sm:$0x1] %v30_v7 }

</bundles_post_ra>
